<compile_context>
chip_gen: v7x
topology: tpu7x:2x2x1
jax: 0.10.0
libtpu: 0.0.40
codegen_flags: <defaults>
</compile_context>

<pallas_src>
import math
from functools import partial

import jax
import jax.numpy as jnp
from jax.experimental import pallas as pl
from jax.experimental.pallas import tpu as pltpu


def _round_up(n, m):
    return ((n + m - 1) // m) * m


def _pad2d(a, rows, cols):
    return jnp.pad(a, ((0, rows - a.shape[0]), (0, cols - a.shape[1])))


# ----------------------------------------------------------------------------------------
# Kernel: one (batch_block, time_block) grid point of the fused Skip-GRU + d1 Linear.
# ----------------------------------------------------------------------------------------
def _skip_gru_seq_kernel(gx_ref, h0_ref, up0_ref, wh_ref, bhn_ref, wdp_ref, bdp_ref,
                         slab_ref, h_ref, up_ref, *, out_cols):
    """h_ref / up_ref are outputs with constant block index over the time axis: they stay
    resident in VMEM across time blocks and act as the recurrent carry (init at t-block 0,
    final state when the grid finishes)."""
    @pl.when(pl.program_id(1) == 0)
    def _init_carry():
        h_ref[...] = h0_ref[...]
        up_ref[...] = up0_ref[...]

    Hp = h_ref.shape[-1]          # padded hidden (multiple of 128)
    OP = slab_ref.shape[-1]       # padded output slab width (multiple of 128)
    TT = gx_ref.shape[0]          # timesteps per grid step (static)

    # Resident weights / biases: read once per grid step, hoisted out of the time loop.
    wh = wh_ref[...]              # [Hp, 3*Hp]
    wdp = wdp_ref[...]            # [Hp, OP]   == [Wd | Wp | 0]
    bhn = bhn_ref[...]            # [1, Hp]
    bdp = bdp_ref[...]            # [1, OP]
    # One-hot lane mask dropping the binary gate u into slab column out_cols+1 (VPU add,
    # keeps the per-step store a single unmasked full-lane vst).
    gate_col = (jax.lax.broadcasted_iota(jnp.int32, (1, OP), 1) == out_cols + 1
                ).astype(jnp.float32)

    def step(tt, carry):
        h, up = carry                                     # [bt, Hp], [bt, 1] (f32 carry)
        gx = gx_ref[tt]                                   # [bt, 3*Hp] (precomputed x-side)
        # Binary update gate. NOTE: floor(x+0.5) rounds 0.5 up; torch.round is
        # round-half-to-even — only inputs exactly at 0.5 can differ (benign).
        u = jnp.floor(up + 0.5)

        gh = jnp.dot(h.astype(wh.dtype), wh, preferred_element_type=jnp.float32)
        r = jax.nn.sigmoid(gx[:, :Hp] + gh[:, :Hp])
        z = jax.nn.sigmoid(gx[:, Hp:2 * Hp] + gh[:, Hp:2 * Hp])
        n = jnp.tanh(gx[:, 2 * Hp:] + r * (gh[:, 2 * Hp:] + bhn))

        h_cand = (1.0 - z) * n + z * h
        new_h = u * h_cand + (1.0 - u) * h

        # d1 Linear fused with the update-probability head (and zero-padded to OP lanes).
        od = jnp.dot(new_h.astype(wdp.dtype), wdp,
                     preferred_element_type=jnp.float32) + bdp          # [bt, OP]
        delta = jax.nn.sigmoid(od[:, out_cols:out_cols + 1])            # [bt, 1]
        new_up = u * delta + (1.0 - u) * (up + jnp.minimum(delta, 1.0 - up))

        slab_ref[tt] = od + u * gate_col   # [out | delta_logit | u | 0], lane-dense store
        return new_h, new_up

    h_fin, up_fin = jax.lax.fori_loop(0, TT, step, (h_ref[...], up_ref[...]),
                                      unroll=True)
    h_ref[...] = h_fin
    up_ref[...] = up_fin


# ----------------------------------------------------------------------------------------
# Parameter packing (padded, fused layout) and the pallas_call wrapper.
# ----------------------------------------------------------------------------------------
def pack_params(p, *, weights_dtype=jnp.float32):
    """Fuse per-gate weights into wide, 128-lane-aligned blocks.

    weights_dtype=jnp.bfloat16 halves resident-weight VMEM on v6e/v7x (dots keep
    preferred_element_type=f32); the carry and elementwise math stay f32.
    """
    wx, wh, bx, bh = p["wx"], p["wh"], p["bx"], p["bh"]
    I, H = wx.shape[1], wx.shape[2]
    O = p["wd"].shape[1]
    Hp = _round_up(H, 128)
    OP = _round_up(O + 2, 128)

    wx_all = jnp.concatenate([_pad2d(wx[g], I, Hp) for g in range(3)], axis=1)   # [I, 3Hp]
    wh_all = jnp.concatenate([_pad2d(wh[g], Hp, Hp) for g in range(3)], axis=1)  # [Hp, 3Hp]
    bx_all = jnp.concatenate([_pad2d(bx[0] + bh[0], 1, Hp),
                              _pad2d(bx[1] + bh[1], 1, Hp),
                              _pad2d(bx[2], 1, Hp)], axis=1)                     # [1, 3Hp]
    bhn = _pad2d(bh[2], 1, Hp)                                                   # [1, Hp]
    wdp = jnp.concatenate([_pad2d(p["wd"], Hp, O), _pad2d(p["wp"], Hp, 1),
                           jnp.zeros((Hp, OP - O - 1), jnp.float32)], axis=1)    # [Hp, OP]
    bdp = jnp.concatenate([p["bd"], p["bp"],
                           jnp.zeros((1, OP - O - 1), jnp.float32)], axis=1)     # [1, OP]

    return {
        "wx_all": wx_all.astype(weights_dtype),
        "wh_all": wh_all.astype(weights_dtype),
        "bx_all": bx_all,
        "bhn": bhn,
        "wdp": wdp.astype(weights_dtype),
        "bdp": bdp,
        "input_size": I, "hidden_size": H, "hidden_pad": Hp,
        "output_size": O, "out_pad": OP,
    }


def skip_gru_sequence(packed, x_seq, hx=None, *, batch_block=None, time_block=None,
                      vmem_limit_bytes=None):
    """Run T Skip-GRU + d1 steps, time loop inside a single pallas_call.

    x_seq: [T, B, I]. Returns (out_seq [T,B,O], (h_final [B,H], up_final [B,1]),
    gate_seq [T,B,1]).
    """
    T, B, I = x_seq.shape
    H, Hp = packed["hidden_size"], packed["hidden_pad"]
    O, OP = packed["output_size"], packed["out_pad"]

    # x-side gate matmul hoisted off the recurrence: one big (T*B, I)@(I, 3Hp) XLA matmul.
    gx_seq = (jnp.dot(x_seq.reshape(T * B, I).astype(packed["wx_all"].dtype),
                      packed["wx_all"], preferred_element_type=jnp.float32)
              + packed["bx_all"]).reshape(T, B, 3 * Hp)

    bt = B if batch_block is None else batch_block
    assert B % bt == 0 and (bt == B or bt % 8 == 0), "batch_block must divide B (mult of 8)"
    nb = B // bt

    if time_block is None:
        time_block = next(c for c in range(min(T, 8), 0, -1) if T % c == 0)
    TT = time_block
    assert T % TT == 0, "time_block must divide T"
    nt = T // TT

    if hx is None:
        h0 = jnp.zeros((B, H), jnp.float32)
        up0 = jnp.ones((B, 1), jnp.float32)   # skip-RNN convention: first step updates
    else:
        h0, up0 = hx
    h0p = jnp.pad(h0.astype(jnp.float32), ((0, 0), (0, Hp - H)))
    up0 = up0.astype(jnp.float32)

    inputs = (gx_seq, h0p, up0, packed["wh_all"], packed["bhn"],
              packed["wdp"], packed["bdp"])

    in_specs = [
        pl.BlockSpec((TT, bt, 3 * Hp), lambda b, t: (t, b, 0)),     # precomputed gx block
        pl.BlockSpec((bt, Hp), lambda b, t: (b, 0)),                # h0
        pl.BlockSpec((bt, 1), lambda b, t: (b, 0)),                 # up0
        pl.BlockSpec((Hp, 3 * Hp), lambda b, t: (0, 0)),            # Wh (resident)
        pl.BlockSpec((1, Hp), lambda b, t: (0, 0)),                 # bhn
        pl.BlockSpec((Hp, OP), lambda b, t: (0, 0)),                # [Wd | Wp | 0] (resident)
        pl.BlockSpec((1, OP), lambda b, t: (0, 0)),                 # [bd | bp | 0]
    ]
    out_shape = (
        jax.ShapeDtypeStruct((T, B, OP), jnp.float32),   # lane-dense slab per step
        jax.ShapeDtypeStruct((B, Hp), jnp.float32),      # final hidden (padded)
        jax.ShapeDtypeStruct((B, 1), jnp.float32),       # final cumulative update prob
    )
    out_specs = (
        pl.BlockSpec((TT, bt, OP), lambda b, t: (t, b, 0)),
        pl.BlockSpec((bt, Hp), lambda b, t: (b, 0)),     # constant over t -> carry
        pl.BlockSpec((bt, 1), lambda b, t: (b, 0)),      # constant over t -> carry
    )

    # Advisory cost (kernel part only; hoisted x matmul is a separate XLA op).
    flops = int(T * B * (2 * Hp * 3 * Hp + 2 * Hp * OP + 14 * Hp))
    transcendentals = int(T * B * (3 * Hp + 1))
    bytes_accessed = int(sum(a.size * a.dtype.itemsize for a in inputs)
                         + sum(math.prod(s.shape) * 4 for s in out_shape))

    slab, h_fin, up_fin = pl.pallas_call(
        partial(_skip_gru_seq_kernel, out_cols=O),
        out_shape=out_shape,
        grid=(nb, nt),
        in_specs=in_specs,
        out_specs=out_specs,
        compiler_params=pltpu.CompilerParams(
            dimension_semantics=("parallel", "arbitrary"),
            vmem_limit_bytes=vmem_limit_bytes,   # set explicitly on v5e (16MiB scoped) / v7x
        ),
        cost_estimate=pl.CostEstimate(flops=flops, transcendentals=transcendentals,
                                      bytes_accessed=bytes_accessed),
    )(*inputs)

    out_seq = slab[:, :, :O]
    gate_seq = slab[:, :, O + 1:O + 2]
    return out_seq, (h_fin[:, :H], up_fin), gate_seq


def cell_module_forward(packed, x, hx=None):
    """Single-step semantics of cellModule.forward: (d1(new_h), hx, updated_state)."""
    out_seq, hx_new, gate_seq = skip_gru_sequence(packed, x[None], hx=hx)
    return out_seq[0], hx_new, gate_seq[0]


# ----------------------------------------------------------------------------------------
# Parameter init (raw stacked layout, PyTorch-like) and pure-JAX references.
# ----------------------------------------------------------------------------------------
def init_params(key, input_size, hidden_size, output_size):
    ks = jax.random.split(key, 8)
    bnd = 1.0 / jnp.sqrt(hidden_size)

    def unif(k, shape):
        return jax.random.uniform(k, shape, jnp.float32, -bnd, bnd)

    return {
        # stacked gate weights: index 0=r, 1=z, 2=n (already transposed for x @ W)
        "wx": unif(ks[0], (3, input_size, hidden_size)),
        "wh": unif(ks[1], (3, hidden_size, hidden_size)),
        "bx": unif(ks[2], (3, 1, hidden_size)),
        "bh": unif(ks[3], (3, 1, hidden_size)),
        # update-probability head (hidden -> 1); bias init = 1 as in the skip-RNN reference
        "wp": unif(ks[4], (hidden_size, 1)),
        "bp": jnp.ones((1, 1), jnp.float32),
        # d1 Linear (hidden -> output), stored pre-transposed
        "wd": unif(ks[5], (hidden_size, output_size)),
        "bd": unif(ks[6], (1, output_size)),
    }


def _reference_step(params, x, h, up):
    u = jnp.floor(up + 0.5)
    rx = x @ params["wx"][0] + params["bx"][0]
    zx = x @ params["wx"][1] + params["bx"][1]
    nx = x @ params["wx"][2] + params["bx"][2]
    rh = h @ params["wh"][0] + params["bh"][0]
    zh = h @ params["wh"][1] + params["bh"][1]
    nh = h @ params["wh"][2] + params["bh"][2]
    r = jax.nn.sigmoid(rx + rh)
    z = jax.nn.sigmoid(zx + zh)
    n = jnp.tanh(nx + r * nh)
    h_cand = (1.0 - z) * n + z * h
    new_h = u * h_cand + (1.0 - u) * h
    delta = jax.nn.sigmoid(new_h @ params["wp"] + params["bp"])
    new_up = u * delta + (1.0 - u) * (up + jnp.minimum(delta, 1.0 - up))
    out = new_h @ params["wd"] + params["bd"]
    return out, new_h, new_up, u


def _reference_sequence(params, x_seq, h0, up0):
    def step(carry, x):
        h, up = carry
        out, nh, nup, u = _reference_step(params, x, h, up)
        return (nh, nup), (out, u)

    (hT, upT), (outs, gates) = jax.lax.scan(step, (h0, up0), x_seq)
    return outs, hT, upT, gates


if __name__ == "__main__":
    B, I, H, O, T = 8, 32, 32, 16, 6
    key = jax.random.PRNGKey(0)
    k_param, k_x, k_h, k_u = jax.random.split(key, 4)

    params = init_params(k_param, I, H, O)
    packed = pack_params(params)

    x_seq = jax.random.normal(k_x, (T, B, I), jnp.float32)
    h0 = jax.random.normal(k_h, (B, H), jnp.float32)
    up0 = jax.random.uniform(k_u, (B, 1), jnp.float32)

    # --- single-step path (exact cellModule.forward semantics) ---
    out, (new_h, new_up), gate = cell_module_forward(packed, x_seq[0], hx=(h0, up0))
    jax.block_until_ready((out, new_h, new_up, gate))

    r_out, r_h, r_up, r_gate = _reference_step(params, x_seq[0], h0, up0)
    assert jnp.allclose(out, r_out, atol=1e-5, rtol=1e-5)
    assert jnp.allclose(new_h, r_h, atol=1e-5, rtol=1e-5)
    assert jnp.allclose(new_up, r_up, atol=1e-5, rtol=1e-5)
    assert jnp.allclose(gate, r_gate, atol=1e-6)

    # --- fused sequence path (time loop + multi-step blocking inside the kernel) ---
    outs, (hT, upT), gates = skip_gru_sequence(packed, x_seq, hx=(h0, up0))
    jax.block_until_ready((outs, hT, upT, gates))

    s_outs, s_h, s_up, s_gates = _reference_sequence(params, x_seq, h0, up0)
    assert jnp.allclose(outs, s_outs, atol=1e-5, rtol=1e-5)
    assert jnp.allclose(hT, s_h, atol=1e-5, rtol=1e-5)
    assert jnp.allclose(upT, s_up, atol=1e-5, rtol=1e-5)
    assert jnp.allclose(gates, s_gates, atol=1e-6)

    # --- hx=None path (zero hidden state, update prob = 1) + explicit time_block ---
    out2, hx2, gate2 = cell_module_forward(packed, x_seq[0], hx=None)
    outs3, hx3, gates3 = skip_gru_sequence(packed, x_seq, hx=(h0, up0),
                                           time_block=3, batch_block=B)
    jax.block_until_ready((out2, hx2, gate2, outs3, hx3, gates3))
    assert jnp.allclose(outs3, s_outs, atol=1e-5, rtol=1e-5)

    print("KERNEL_OK")
</pallas_src>

<mosaic_0001>
module attributes {stable_mosaic.version = 11 : i64} {
  func.func @_skip_gru_seq_kernel(%arg0: i32, %arg1: i32, %arg2: memref<1x8x384xf32, #tpu.memory_space<vmem>>, %arg3: memref<8x128xf32, #tpu.memory_space<vmem>>, %arg4: memref<8x1xf32, #tpu.memory_space<vmem>>, %arg5: memref<128x384xf32, #tpu.memory_space<vmem>>, %arg6: memref<1x128xf32, #tpu.memory_space<vmem>>, %arg7: memref<128x128xf32, #tpu.memory_space<vmem>>, %arg8: memref<1x128xf32, #tpu.memory_space<vmem>>, %arg9: memref<1x8x128xf32, #tpu.memory_space<vmem>>, %arg10: memref<8x128xf32, #tpu.memory_space<vmem>>, %arg11: memref<8x1xf32, #tpu.memory_space<vmem>>) attributes {dimension_semantics = [#tpu.dimension_semantics<parallel>, #tpu.dimension_semantics<arbitrary>], iteration_bounds = array<i64: 1, 1>, scalar_prefetch = 0 : i64, scratch_operands = 0 : i64, tpu.core_type = #tpu.core_type<tc>, window_params = [{transform_indices = @transform_0, window_bounds = array<i64: 1, 8, 384>}, {transform_indices = @transform_1, window_bounds = array<i64: 8, 128>}, {transform_indices = @transform_2, window_bounds = array<i64: 8, 1>}, {pipeline_mode = #tpu.pipeline_mode<synchronous>, transform_indices = @transform_3, window_bounds = array<i64: 128, 384>}, {pipeline_mode = #tpu.pipeline_mode<synchronous>, transform_indices = @transform_4, window_bounds = array<i64: 1, 128>}, {pipeline_mode = #tpu.pipeline_mode<synchronous>, transform_indices = @transform_5, window_bounds = array<i64: 128, 128>}, {pipeline_mode = #tpu.pipeline_mode<synchronous>, transform_indices = @transform_6, window_bounds = array<i64: 1, 128>}, {transform_indices = @transform_7, window_bounds = array<i64: 1, 8, 128>}, {transform_indices = @transform_8, window_bounds = array<i64: 8, 128>}, {transform_indices = @transform_9, window_bounds = array<i64: 8, 1>}]} {
    %c0_i32 = arith.constant 0 : i32
    %0 = arith.cmpi eq, %arg1, %c0_i32 : i32
    %1 = arith.extui %0 : i1 to i32
    %c0_i32_0 = arith.constant 0 : i32
    %2 = arith.cmpi ne, %1, %c0_i32_0 : i32
    scf.if %2 {
      %c0_30 = arith.constant 0 : index
      %c0_31 = arith.constant 0 : index
      %84 = vector.load %arg3[%c0_30, %c0_31] : memref<8x128xf32, #tpu.memory_space<vmem>>, vector<8x128xf32>
      %c0_32 = arith.constant 0 : index
      %c0_33 = arith.constant 0 : index
      %85 = vector.load %arg10[%c0_32, %c0_33] : memref<8x128xf32, #tpu.memory_space<vmem>>, vector<8x128xf32>
      tpu.vector_store %arg10[%c0_32, %c0_33], %84 {strides = array<i32>} : memref<8x128xf32, #tpu.memory_space<vmem>>, vector<8x128xf32>,
      %c0_34 = arith.constant 0 : index
      %c0_35 = arith.constant 0 : index
      %86 = vector.load %arg4[%c0_34, %c0_35] : memref<8x1xf32, #tpu.memory_space<vmem>>, vector<8x1xf32>
      %c0_36 = arith.constant 0 : index
      %c0_37 = arith.constant 0 : index
      %87 = vector.load %arg11[%c0_36, %c0_37] : memref<8x1xf32, #tpu.memory_space<vmem>>, vector<8x1xf32>
      tpu.vector_store %arg11[%c0_36, %c0_37], %86 {strides = array<i32>} : memref<8x1xf32, #tpu.memory_space<vmem>>, vector<8x1xf32>,
    } else {
    }
    %c0 = arith.constant 0 : index
    %c0_1 = arith.constant 0 : index
    %3 = vector.load %arg5[%c0, %c0_1] : memref<128x384xf32, #tpu.memory_space<vmem>>, vector<128x384xf32>
    %c0_2 = arith.constant 0 : index
    %c0_3 = arith.constant 0 : index
    %4 = vector.load %arg7[%c0_2, %c0_3] : memref<128x128xf32, #tpu.memory_space<vmem>>, vector<128x128xf32>
    %c0_4 = arith.constant 0 : index
    %c0_5 = arith.constant 0 : index
    %5 = vector.load %arg6[%c0_4, %c0_5] : memref<1x128xf32, #tpu.memory_space<vmem>>, vector<1x128xf32>
    %c0_6 = arith.constant 0 : index
    %c0_7 = arith.constant 0 : index
    %6 = vector.load %arg8[%c0_6, %c0_7] : memref<1x128xf32, #tpu.memory_space<vmem>>, vector<1x128xf32>
    %7 = tpu.iota {dimensions = array<i32: 1>} : vector<1x128xi32>
    %c17_i32 = arith.constant 17 : i32
    %8 = vector.broadcast %c17_i32 : i32 to vector<1x128xi32>
    %9 = arith.cmpi eq, %7, %8 : vector<1x128xi32>
    %10 = arith.extui %9 : vector<1x128xi1> to vector<1x128xi32>
    %11 = arith.sitofp %10 : vector<1x128xi32> to vector<1x128xf32>
    %c0_8 = arith.constant 0 : index
    %c0_9 = arith.constant 0 : index
    %12 = vector.load %arg10[%c0_8, %c0_9] : memref<8x128xf32, #tpu.memory_space<vmem>>, vector<8x128xf32>
    %c0_10 = arith.constant 0 : index
    %c0_11 = arith.constant 0 : index
    %13 = vector.load %arg11[%c0_10, %c0_11] : memref<8x1xf32, #tpu.memory_space<vmem>>, vector<8x1xf32>
    %c0_i32_12 = arith.constant 0 : i32
    %14 = arith.index_cast %c0_i32_12 : i32 to index
    %c0_13 = arith.constant 0 : index
    %c0_14 = arith.constant 0 : index
    %15 = vector.load %arg2[%14, %c0_13, %c0_14] : memref<1x8x384xf32, #tpu.memory_space<vmem>>, vector<1x8x384xf32>
    %16 = vector.shape_cast %15 : vector<1x8x384xf32> to vector<8x384xf32>
    %cst = arith.constant 5.000000e-01 : f32
    %17 = vector.broadcast %cst : f32 to vector<8x1xf32>
    %18 = arith.addf %13, %17 : vector<8x1xf32>
    %19 = math.floor %18 : vector<8x1xf32>
    %cst_15 = arith.constant dense<0.000000e+00> : vector<8x384xf32>
    %20 = tpu.matmul %12, %3, %cst_15 {dimension_numbers = #tpu.dot_dimension_numbers<[1], [0], [0], [1], [0, 0, 1, 1], [], []>} : vector<8x128xf32>, vector<128x384xf32>, vector<8x384xf32> -> vector<8x384xf32>
    %21 = vector.extract_strided_slice %16 {offsets = [0, 0], sizes = [8, 128], strides = [1, 1]} : vector<8x384xf32> to vector<8x128xf32>
    %22 = vector.extract_strided_slice %20 {offsets = [0, 0], sizes = [8, 128], strides = [1, 1]} : vector<8x384xf32> to vector<8x128xf32>
    %23 = arith.addf %21, %22 : vector<8x128xf32>
    %24 = arith.negf %23 : vector<8x128xf32>
    %25 = math.exp %24 : vector<8x128xf32>
    %cst_16 = arith.constant 1.000000e+00 : f32
    %26 = vector.broadcast %cst_16 : f32 to vector<8x128xf32>
    %27 = arith.addf %26, %25 : vector<8x128xf32>
    %28 = arith.divf %26, %27 : vector<8x128xf32>
    %29 = vector.extract_strided_slice %16 {offsets = [0, 128], sizes = [8, 128], strides = [1, 1]} : vector<8x384xf32> to vector<8x128xf32>
    %30 = vector.extract_strided_slice %20 {offsets = [0, 128], sizes = [8, 128], strides = [1, 1]} : vector<8x384xf32> to vector<8x128xf32>
    %31 = arith.addf %29, %30 : vector<8x128xf32>
    %32 = arith.negf %31 : vector<8x128xf32>
    %33 = math.exp %32 : vector<8x128xf32>
    %cst_17 = arith.constant 1.000000e+00 : f32
    %34 = vector.broadcast %cst_17 : f32 to vector<8x128xf32>
    %35 = arith.addf %34, %33 : vector<8x128xf32>
    %36 = arith.divf %34, %35 : vector<8x128xf32>
    %37 = vector.extract_strided_slice %16 {offsets = [0, 256], sizes = [8, 128], strides = [1, 1]} : vector<8x384xf32> to vector<8x128xf32>
    %38 = vector.extract_strided_slice %20 {offsets = [0, 256], sizes = [8, 128], strides = [1, 1]} : vector<8x384xf32> to vector<8x128xf32>
    %39 = vector.broadcast %5 : vector<1x128xf32> to vector<8x128xf32>
    %40 = arith.addf %38, %39 : vector<8x128xf32>
    %41 = arith.mulf %28, %40 : vector<8x128xf32>
    %42 = arith.addf %37, %41 : vector<8x128xf32>
    %43 = math.tanh %42 : vector<8x128xf32>
    %cst_18 = arith.constant 1.000000e+00 : f32
    %44 = vector.broadcast %cst_18 : f32 to vector<8x128xf32>
    %45 = arith.subf %44, %36 : vector<8x128xf32>
    %46 = arith.mulf %45, %43 : vector<8x128xf32>
    %47 = arith.mulf %36, %12 : vector<8x128xf32>
    %48 = arith.addf %46, %47 : vector<8x128xf32>
    %49 = vector.broadcast %19 : vector<8x1xf32> to vector<8x128xf32>
    %50 = arith.mulf %49, %48 : vector<8x128xf32>
    %cst_19 = arith.constant 1.000000e+00 : f32
    %51 = vector.broadcast %cst_19 : f32 to vector<8x1xf32>
    %52 = arith.subf %51, %19 : vector<8x1xf32>
    %53 = vector.broadcast %52 : vector<8x1xf32> to vector<8x128xf32>
    %54 = arith.mulf %53, %12 : vector<8x128xf32>
    %55 = arith.addf %50, %54 : vector<8x128xf32>
    %cst_20 = arith.constant dense<0.000000e+00> : vector<8x128xf32>
    %56 = tpu.matmul %55, %4, %cst_20 {dimension_numbers = #tpu.dot_dimension_numbers<[1], [0], [0], [1], [0, 0, 1, 1], [], []>} : vector<8x128xf32>, vector<128x128xf32>, vector<8x128xf32> -> vector<8x128xf32>
    %57 = vector.broadcast %6 : vector<1x128xf32> to vector<8x128xf32>
    %58 = arith.addf %56, %57 : vector<8x128xf32>
    %59 = vector.extract_strided_slice %58 {offsets = [0, 16], sizes = [8, 1], strides = [1, 1]} : vector<8x128xf32> to vector<8x1xf32>
    %60 = arith.negf %59 : vector<8x1xf32>
    %61 = math.exp %60 : vector<8x1xf32>
    %cst_21 = arith.constant 1.000000e+00 : f32
    %62 = vector.broadcast %cst_21 : f32 to vector<8x1xf32>
    %63 = arith.addf %62, %61 : vector<8x1xf32>
    %64 = arith.divf %62, %63 : vector<8x1xf32>
    %65 = arith.mulf %19, %64 : vector<8x1xf32>
    %cst_22 = arith.constant 1.000000e+00 : f32
    %66 = vector.broadcast %cst_22 : f32 to vector<8x1xf32>
    %67 = arith.subf %66, %19 : vector<8x1xf32>
    %cst_23 = arith.constant 1.000000e+00 : f32
    %68 = vector.broadcast %cst_23 : f32 to vector<8x1xf32>
    %69 = arith.subf %68, %13 : vector<8x1xf32>
    %70 = arith.minimumf %64, %69 : vector<8x1xf32>
    %71 = arith.addf %13, %70 : vector<8x1xf32>
    %72 = arith.mulf %67, %71 : vector<8x1xf32>
    %73 = arith.addf %65, %72 : vector<8x1xf32>
    %74 = vector.broadcast %19 : vector<8x1xf32> to vector<8x128xf32>
    %75 = vector.broadcast %11 : vector<1x128xf32> to vector<8x128xf32>
    %76 = arith.mulf %74, %75 : vector<8x128xf32>
    %77 = arith.addf %58, %76 : vector<8x128xf32>
    %78 = arith.index_cast %c0_i32_12 : i32 to index
    %c0_24 = arith.constant 0 : index
    %c0_25 = arith.constant 0 : index
    %79 = vector.load %arg9[%78, %c0_24, %c0_25] : memref<1x8x128xf32, #tpu.memory_space<vmem>>, vector<1x8x128xf32>
    %80 = vector.shape_cast %79 : vector<1x8x128xf32> to vector<8x128xf32>
    %81 = vector.shape_cast %77 : vector<8x128xf32> to vector<1x8x128xf32>
    tpu.vector_store %arg9[%78, %c0_24, %c0_25], %81 {strides = array<i32>} : memref<1x8x128xf32, #tpu.memory_space<vmem>>, vector<1x8x128xf32>,
    %c1_i32 = arith.constant 1 : i32
    %c0_26 = arith.constant 0 : index
    %c0_27 = arith.constant 0 : index
    %82 = vector.load %arg10[%c0_26, %c0_27] : memref<8x128xf32, #tpu.memory_space<vmem>>, vector<8x128xf32>
    tpu.vector_store %arg10[%c0_26, %c0_27], %55 {strides = array<i32>} : memref<8x128xf32, #tpu.memory_space<vmem>>, vector<8x128xf32>,
    %c0_28 = arith.constant 0 : index
    %c0_29 = arith.constant 0 : index
    %83 = vector.load %arg11[%c0_28, %c0_29] : memref<8x1xf32, #tpu.memory_space<vmem>>, vector<8x1xf32>
    tpu.vector_store %arg11[%c0_28, %c0_29], %73 {strides = array<i32>} : memref<8x1xf32, #tpu.memory_space<vmem>>, vector<8x1xf32>,
    return
  }
  func.func @transform_0(%arg0: i32, %arg1: i32) -> (i32, i32, i32) {
    %c0_i32 = arith.constant 0 : i32
    %c0_i32_0 = arith.constant 0 : i32
    return %arg1, %arg0, %c0_i32 : i32, i32, i32
  }
  func.func @transform_1(%arg0: i32, %arg1: i32) -> (i32, i32) {
    %c0_i32 = arith.constant 0 : i32
    %c0_i32_0 = arith.constant 0 : i32
    return %arg0, %c0_i32 : i32, i32
  }
  func.func @transform_2(%arg0: i32, %arg1: i32) -> (i32, i32) {
    %c0_i32 = arith.constant 0 : i32
    %c0_i32_0 = arith.constant 0 : i32
    return %arg0, %c0_i32 : i32, i32
  }
  func.func @transform_3(%arg0: i32, %arg1: i32) -> (i32, i32) {
    %c0_i32 = arith.constant 0 : i32
    %c0_i32_0 = arith.constant 0 : i32
    %c0_i32_1 = arith.constant 0 : i32
    return %c0_i32, %c0_i32_0 : i32, i32
  }
  func.func @transform_4(%arg0: i32, %arg1: i32) -> (i32, i32) {
    %c0_i32 = arith.constant 0 : i32
    %c0_i32_0 = arith.constant 0 : i32
    %c0_i32_1 = arith.constant 0 : i32
    return %c0_i32, %c0_i32_0 : i32, i32
  }
  func.func @transform_5(%arg0: i32, %arg1: i32) -> (i32, i32) {
    %c0_i32 = arith.constant 0 : i32
    %c0_i32_0 = arith.constant 0 : i32
    %c0_i32_1 = arith.constant 0 : i32
    return %c0_i32, %c0_i32_0 : i32, i32
  }
  func.func @transform_6(%arg0: i32, %arg1: i32) -> (i32, i32) {
    %c0_i32 = arith.constant 0 : i32
    %c0_i32_0 = arith.constant 0 : i32
    %c0_i32_1 = arith.constant 0 : i32
    return %c0_i32, %c0_i32_0 : i32, i32
  }
  func.func @transform_7(%arg0: i32, %arg1: i32) -> (i32, i32, i32) {
    %c0_i32 = arith.constant 0 : i32
    %c0_i32_0 = arith.constant 0 : i32
    return %arg1, %arg0, %c0_i32 : i32, i32, i32
  }
  func.func @transform_8(%arg0: i32, %arg1: i32) -> (i32, i32) {
    %c0_i32 = arith.constant 0 : i32
    %c0_i32_0 = arith.constant 0 : i32
    return %arg0, %c0_i32 : i32, i32
  }
  func.func @transform_9(%arg0: i32, %arg1: i32) -> (i32, i32) {
    %c0_i32 = arith.constant 0 : i32
    %c0_i32_0 = arith.constant 0 : i32
    return %arg0, %c0_i32 : i32, i32
  }
}

</mosaic_0001>

<bundles_post_ra>
// kernel: tpu_custom_call.1
= control target key start
LH: loop header
LB: loop body
LE: loop exit
PB: predicated region body
PF: predicated region fallthrough
CT: control target
= control target key end

     0   :  { %15 = vsyncpa [#allocation3], 0  ;;  %s1008_s0 = inlined_call_operand.hbm [shape: f32[1,8,384], index: 0, kind: input, shape index: {}]   ;;  %s1009_s1 = inlined_call_operand.vmem [shape: f32[8,128], index: 1, kind: input, shape index: {}]   ;;  %s1010_s2 = inlined_call_operand.vmem [shape: f32[8,1], index: 2, kind: input, shape index: {}]   ;;  %s1011_s3 = inlined_call_operand.hbm [shape: f32[128,384], index: 3, kind: input, shape index: {}]   ;;  %s1012_s4 = inlined_call_operand.vmem [shape: f32[1,128], index: 4, kind: input, shape index: {}]   ;;  %s1013_s5 = inlined_call_operand.hbm [shape: f32[128,128], index: 5, kind: input, shape index: {}]   ;;  %s1014_s6 = inlined_call_operand.vmem [shape: f32[1,128], index: 6, kind: input, shape index: {}]   ;;  %s1015_s7 = inlined_call_operand.hbm [shape: f32[1,8,128], index: 7, kind: output, shape index: {0}]   ;;  %s1016_s8 = inlined_call_operand.hbm [shape: f32[8,128], index: 8, kind: output, shape index: {1}]   ;;  %s1017_s9 = inlined_call_operand.vmem [shape: f32[8,1], index: 9, kind: output, shape index: {2}]  }
   0x1   :  { %16 = vsyncpa [#allocation6], 0 }
   0x2   :  { %17 = vsyncpa [#allocation4], 0 }
   0x3   :  { %18 = vsyncpa [#allocation10], 0  ;;  %s818_s30 = smov [#allocation5]   ;;  %s700_s13 = scalar_lea.hbm %s1011_s3, 6144 }
   0x4   :  { %s38_s10 = sshll.u32 %s818_s30, 4  ;;  %p701_p0 = scmp.ne.s32.totalorder %s1011_s3, %s700_s13  ;;  %s39_s10 = int_to_ptr.vmem [resolvable:$true] %s38_s10 }
   0x5   :  { %p704_p1 = scmp.lt.u32.totalorder %s700_s13, %s1011_s3 }
   0x7   :  { %p706_p2 = pnand %p704_p1, %p701_p0 }
   0x9   :  { %709 = shalt.err (!%p706_p2)
}
   0xa   :  { %s710_s18 = scalar_lea.vmem %s39_s10, 6144  ;;  %p715_p4 = scmp.lt.s32.totalorder %s39_s10, %s39_s10 }
   0xb   :  { %p711_p3 = scmp.ne.s32.totalorder %s39_s10, %s710_s18  ;;  %p716_p5 = scmp.lt.s32.totalorder %s710_s18, %s710_s18 }
   0xd   :  { %p717_p6 = por %p716_p5, %p715_p4 }
   0xf   :  { %p718_p7 = pnand %p717_p6, %p711_p3 }
  0x11   :  { %721 = shalt.err (!%p718_p7)
}
  0x12   :  { %s819_s19 = smov 384   ;;  %s820_s20 = smov 24  }
  0x13   :  { %44 = dma.hbm_to_vmem [thread:$0]  %s1011_s3, 6144, %s39_s10, [#allocation6], %s819_s19, %s819_s19, %s820_s20  }
  0x14   :  { %s821_s23 = smov [#allocation2]   ;;  %s822_s25 = smov [#allocation7]  }
  0x15   :  { %s25_s24 = sshll.u32 %s821_s23, 4  ;;  %s52_s26 = sshll.u32 %s822_s25, 4  ;;  %s26_s24 = int_to_ptr.vmem [resolvable:$true] %s25_s24  ;;  %s53_s26 = int_to_ptr.vmem [resolvable:$true] %s52_s26 }
  0x16   :  { %s722_s29 = scalar_lea.hbm %s1008_s0, 384 }
  0x17   :  { %p723_p8 = scmp.ne.s32.totalorder %s1008_s0, %s722_s29  ;;  %p726_p9 = scmp.lt.u32.totalorder %s722_s29, %s1008_s0 }
  0x19   :  { %p728_p10 = pnand %p726_p9, %p723_p8 }
  0x1b   :  { %731 = shalt.err (!%p728_p10)
}
  0x1c   :  { %s732_s3 = scalar_lea.vmem %s26_s24, 384  ;;  %p737_p12 = scmp.lt.s32.totalorder %s26_s24, %s26_s24 }
  0x1d   :  { %p733_p11 = scmp.ne.s32.totalorder %s26_s24, %s732_s3  ;;  %p738_p13 = scmp.lt.s32.totalorder %s732_s3, %s732_s3 }
  0x1f   :  { %p739_p0 = por %p738_p13, %p737_p12 }
  0x21   :  { %p740_p1 = pnand %p739_p0, %p733_p11 }
  0x23   :  { %743 = shalt.err (!%p740_p1)
}
  0x24   :  { %28 = dma.hbm_to_vmem [thread:$0]  %s1008_s0, 384, %s26_s24, [#allocation3]  }
  0x25   :  { %s744_s17 = scalar_lea.hbm %s1013_s5, 2048 }
  0x26   :  { %p745_p2 = scmp.ne.s32.totalorder %s1013_s5, %s744_s17  ;;  %p748_p3 = scmp.lt.u32.totalorder %s744_s17, %s1013_s5 }
  0x28   :  { %p750_p4 = pnand %p748_p3, %p745_p2 }
  0x2a   :  { %753 = shalt.err (!%p750_p4)
}
  0x2b   :  { %s754_s22 = scalar_lea.vmem %s53_s26, 2048  ;;  %p759_p6 = scmp.lt.s32.totalorder %s53_s26, %s53_s26 }
  0x2c   :  { %p755_p5 = scmp.ne.s32.totalorder %s53_s26, %s754_s22  ;;  %p760_p7 = scmp.lt.s32.totalorder %s754_s22, %s754_s22 }
  0x2e   :  { %p761_p8 = por %p760_p7, %p759_p6 }
  0x30   :  { %p762_p9 = pnand %p761_p8, %p755_p5 }
  0x32   :  { %765 = shalt.err (!%p762_p9)
}
  0x33   :  { %s823_s0 = smov 128   ;;  %s824_s23 = smov 8  }
  0x34   :  { %58 = dma.hbm_to_vmem [thread:$0]  %s1013_s5, 2048, %s53_s26, [#allocation6], %s823_s0, %s823_s0, %s824_s23  }
  0x35   :  { %810 = dma.done.wait [#allocation3], 384  }
  0x36   :  { %811 = vsyncadd [#allocation3], 4294966912 }
  0x37   :  { %812 = dma.done.wait [#allocation6], 8192  }
  0x38   :  { %813 = vsyncadd [#allocation6], 4294959104  ;;  %v825_v0 = vmov 0.0|0.0   ;;  %v826_v1 = vmov 0.0   ;;  %vm827_vm0 = vmmov 0   ;;  %v828_v2 = vmov 0  }
  0x39   :  { %622 = vmatprep.subr.bf16.mxu1 %v825_v0  ;;  %221 = vmatprep.mubr.f32.mxu0 %v826_v1  ;;  %v80_v3 = vld [vmem:[#allocation5 + $0x8] sm:$0xff]  ;;  %v83_v4 = vld [vmem:[#allocation5 + $0x20] sm:$0xff]  ;;  %v82_v7 = vld [vmem:[#allocation5 + $0x18] sm:$0xff]  ;;  %vm77_vm1 = vcmask 7168   ;;  %s830_s10 = smov [#allocation8]   ;;  %s831_s15 = smov [#allocation9]  }
  0x3a   :  { %552 = vmatprep.mubr.msk.f32.mxu1 %vm827_vm0, %v826_v1  ;;  %685 = vset.pattern.permute.xlu0 %v828_v2  ;;  %v79_v5 = vld [vmem:[#allocation5] sm:$0xff]  ;;  %v590_v6 = vpack.c.bf16 %v83_v4, %v80_v3  ;;  %v86_v8 = vld [vmem:[#allocation5 + $0x38] sm:$0xff]  ;;  %v89_v9 = vld [vmem:[#allocation5 + $0x50] sm:$0xff]  ;;  %s452_s14 = sshll.u32 %s830_s10, 4  ;;  %s462_s16 = sshll.u32 %s831_s15, 4  ;;  %s453_s14 = int_to_ptr.vmem [resolvable:$true] %s452_s14  ;;  %s463_s16 = int_to_ptr.vmem [resolvable:$true] %s462_s16 }
  0x3b   :  { %v592_v10 = vpack.c.bf16 %v82_v7, %v79_v5  ;;  %v594_v11 = vpack.c.bf16 %v89_v9, %v86_v8  ;;  %v85_v12 = vld [vmem:[#allocation5 + $0x30] sm:$0xff]  ;;  %v88_v13 = vld [vmem:[#allocation5 + $0x48] sm:$0xff]  ;;  %v95_v15 = vld [vmem:[#allocation5 + $0x80] sm:$0xff]  ;;  %s766_s17 = scalar_lea.vmem %s453_s14, 128  ;;  %p771_p11 = scmp.lt.s32.totalorder %s453_s14, %s453_s14 }
  0x3c   :  { %v92_v14 = vld [vmem:[#allocation5 + $0x68] sm:$0xff]  ;;  %591 = vmatprep.subr.bf16.mxu0 %v590_v6  ;;  %v596_v16 = vpack.c.bf16 %v88_v13, %v85_v12  ;;  %v91_v18 = vld [vmem:[#allocation5 + $0x60] sm:$0xff]  ;;  %v94_v19 = vld [vmem:[#allocation5 + $0x78] sm:$0xff]  ;;  %p767_p10 = scmp.ne.s32.totalorder %s453_s14, %s766_s17  ;;  %p772_p12 = scmp.lt.s32.totalorder %s766_s17, %s766_s17 }
  0x3d   :  { %593 = vmatpush1.bf16.msra.mxu0 %v592_v10  ;;  %v598_v17 = vpack.c.bf16 %v95_v15, %v92_v14  ;;  %v98_v20 = vld [vmem:[#allocation5 + $0x98] sm:$0xff]  ;;  %v101_v21 = vld [vmem:[#allocation5 + $0xb0] sm:$0xff]  ;;  %v600_v22 = vpack.c.bf16 %v94_v19, %v91_v18  ;;  %v100_v25 = vld [vmem:[#allocation5 + $0xa8] sm:$0xff] }
  0x3e   :  { %595 = vmatprep.subr.bf16.mxu0 %v594_v11  ;;  %v97_v23 = vld [vmem:[#allocation5 + $0x90] sm:$0xff]  ;;  %v602_v24 = vpack.c.bf16 %v101_v21, %v98_v20  ;;  %v84_v27 = vld [vmem:[#allocation5 + $0x28] sm:$0xff]  ;;  %v107_v29 = vld [vmem:[#allocation5 + $0xe0] sm:$0xff]  ;;  %p773_p13 = por %p772_p12, %p771_p11 }
  0x3f   :  { %v81_v26 = vld [vmem:[#allocation5 + $0x10] sm:$0xff]  ;;  %v104_v28 = vld [vmem:[#allocation5 + $0xc8] sm:$0xff]  ;;  %v87_v31 = vld [vmem:[#allocation5 + $0x40] sm:$0xff]  ;;  %v604_v33 = vpack.c.bf16 %v100_v25, %v97_v23 }
  0x40   :  { %v623_v30 = vpack.c.bf16 %v84_v27, %v81_v26  ;;  %v90_v32 = vld [vmem:[#allocation5 + $0x58] sm:$0xff]  ;;  %v103_v34 = vld [vmem:[#allocation5 + $0xc0] sm:$0xff]  ;;  %v606_v36 = vpack.c.bf16 %v107_v29, %v104_v28  ;;  %v93_v38 = vld [vmem:[#allocation5 + $0x70] sm:$0xff]  ;;  %p774_p0 = pnand %p773_p13, %p767_p10 }
  0x41   :  { %597 = vmatpush1.bf16.msra.mxu0 %v596_v16  ;;  %v626_v35 = vpack.c.bf16 %v90_v32, %v87_v31  ;;  %v106_v37 = vld [vmem:[#allocation5 + $0xd8] sm:$0xff]  ;;  %v96_v39 = vld [vmem:[#allocation5 + $0x88] sm:$0xff]  ;;  %v113_v41 = vld [vmem:[#allocation5 + $0x110] sm:$0xff] }
  0x42   :  { %599 = vmatprep.subr.bf16.mxu0 %v598_v17  ;;  %624 = vmatpush3.bf16.msra.mxu1 %v623_v30  ;;  %v110_v40 = vld [vmem:[#allocation5 + $0xf8] sm:$0xff]  ;;  %v608_v42 = vpack.c.bf16 %v106_v37, %v103_v34  ;;  %v109_v43 = vld [vmem:[#allocation5 + $0xf0] sm:$0xff]  ;;  %v629_v44 = vpack.c.bf16 %v96_v39, %v93_v38  ;;  %v76_v45 = vld [vmem:[%s1010_s2] sm:$0xff] }
  0x43   :  { %625 = vmatprep.subr.bf16.mxu1 %v825_v0  ;;  %v610_v46 = vpack.c.bf16 %v113_v41, %v110_v40  ;;  %v112_v47 = vld [vmem:[#allocation5 + $0x108] sm:$0xff]  ;;  %v99_v48 = vld [vmem:[#allocation5 + $0xa0] sm:$0xff]  ;;  %v102_v49 = vld [vmem:[#allocation5 + $0xb8] sm:$0xff]  ;;  %78 = vst.msk [vmem:[%s1017_s9] sm:$0xff] %vm77_vm1, %v76_v45 }
  0x44   :  { %v116_v50 = vld [vmem:[#allocation5 + $0x128] sm:$0xff]  ;;  %v119_v51 = vld [vmem:[#allocation5 + $0x140] sm:$0xff]  ;;  %v612_v52 = vpack.c.bf16 %v112_v47, %v109_v43  ;;  %v632_v54 = vpack.c.bf16 %v102_v49, %v99_v48  ;;  %v118_v56 = vld [vmem:[#allocation5 + $0x138] sm:$0xff] }
  0x45   :  { %601 = vmatpush1.bf16.msra.mxu0 %v600_v22  ;;  %v115_v53 = vld [vmem:[#allocation5 + $0x120] sm:$0xff]  ;;  %v614_v55 = vpack.c.bf16 %v119_v51, %v116_v50  ;;  %v105_v57 = vld [vmem:[#allocation5 + $0xd0] sm:$0xff]  ;;  %v108_v58 = vld [vmem:[#allocation5 + $0xe8] sm:$0xff] }
  0x46   :  { %603 = vmatprep.subr.bf16.mxu0 %v602_v24  ;;  %627 = vmatpush3.bf16.msra.mxu1 %v626_v35  ;;  %v122_v59 = vld [vmem:[#allocation5 + $0x158] sm:$0xff]  ;;  %v125_v60 = vld [vmem:[#allocation5 + $0x170] sm:$0xff]  ;;  %v616_v61 = vpack.c.bf16 %v118_v56, %v115_v53  ;;  %v635_v63 = vpack.c.bf16 %v108_v58, %v105_v57  ;;  %v124_v4 = vld [vmem:[#allocation5 + $0x168] sm:$0xff] }
  0x47   :  { %628 = vmatprep.subr.bf16.mxu1 %v825_v0  ;;  %v121_v62 = vld [vmem:[#allocation5 + $0x150] sm:$0xff]  ;;  %v618_v3 = vpack.c.bf16 %v125_v60, %v122_v59  ;;  %v111_v5 = vld [vmem:[#allocation5 + $0x100] sm:$0xff]  ;;  %v114_v6 = vld [vmem:[#allocation5 + $0x118] sm:$0xff] }
  0x48   :  { %v620_v9 = vpack.c.bf16 %v124_v4, %v121_v62  ;;  %v638_v10 = vpack.c.bf16 %v114_v6, %v111_v5  ;;  %v117_v11 = vld [vmem:[#allocation5 + $0x130] sm:$0xff]  ;;  %v120_v12 = vld [vmem:[#allocation5 + $0x148] sm:$0xff]  ;;  %v123_v16 = vld [vmem:[#allocation5 + $0x160] sm:$0xff] }
  0x49   :  { %605 = vmatpush1.bf16.msra.mxu0 %v604_v33  ;;  %v948_v14 = vld [vmem:[%s1009_s1] sm:$0xff]  ;;  %v641_v15 = vpack.c.bf16 %v120_v12, %v117_v11  ;;  %v126_v17 = vld [vmem:[#allocation5 + $0x178] sm:$0xff]  ;;  %v127_v19 = vld [vmem:[#allocation7] sm:$0xff]  ;;  %s829_s1 = smov 16  }
  0x4a   :  { %607 = vmatprep.subr.bf16.mxu0 %v606_v36  ;;  %630 = vmatpush3.bf16.msra.mxu1 %v629_v44  ;;  %v936_v2 = vld [vmem:[%s1017_s9] sm:$0xff]  ;;  %v644_v18 = vpack.c.bf16 %v126_v17, %v123_v16  ;;  %v129_v22 = vld [vmem:[#allocation7 + $0x10] sm:$0xff]  ;;  %v130_v23 = vld [vmem:[#allocation7 + $0x18] sm:$0xff]  ;;  %v145_v16 = vlaneseq }
  0x4b   :  { %631 = vmatprep.subr.bf16.mxu1 %v825_v0  ;;  %v155_v7 = vadd.f32 0.5, %v936_v2  ;;  %v128_v20 = vld [vmem:[#allocation7 + $0x8] sm:$0xff]  ;;  %v650_v24 = vpack.c.bf16 %v130_v23, %v129_v22  ;;  %v131_v25 = vld [vmem:[#allocation7 + $0x20] sm:$0xff]  ;;  %v133_v28 = vld [vmem:[#allocation7 + $0x30] sm:$0xff]  ;;  %v427_v43 = vsub.f32 1.0, %v936_v2 }
  0x4c   :  { %v647_v21 = vpack.c.bf16 %v128_v20, %v127_v19  ;;  %v132_v26 = vld [vmem:[#allocation7 + $0x28] sm:$0xff]  ;;  %v134_v29 = vld [vmem:[#allocation7 + $0x38] sm:$0xff]  ;;  %v135_v31 = vld [vmem:[#allocation7 + $0x40] sm:$0xff]  ;;  %v146_v17 = vand.u32 127, %v145_v16 }
  0x4d   :  { %609 = vmatpush1.bf16.msra.mxu0 %v608_v42  ;;  %v940_v8 = vfloor.f32 %v155_v7  ;;  %v653_v27 = vpack.c.bf16 %v132_v26, %v131_v25  ;;  %v656_v30 = vpack.c.bf16 %v134_v29, %v133_v28  ;;  %v136_v32 = vld [vmem:[#allocation7 + $0x48] sm:$0xff]  ;;  %v137_v34 = vld [vmem:[#allocation7 + $0x50] sm:$0xff]  ;;  %v138_v35 = vld [vmem:[#allocation7 + $0x58] sm:$0xff]  ;;  %429 = vrot.lane.b32.xlu1 %v427_v43, %s829_s1 }
  0x4e   :  { %611 = vmatprep.subr.bf16.mxu0 %v610_v46  ;;  %633 = vmatpush3.bf16.msra.mxu1 %v632_v54  ;;  %v659_v33 = vpack.c.bf16 %v136_v32, %v135_v31  ;;  %v662_v36 = vpack.c.bf16 %v138_v35, %v137_v34  ;;  %v139_v37 = vld [vmem:[#allocation7 + $0x60] sm:$0xff]  ;;  %v140_v38 = vld [vmem:[#allocation7 + $0x68] sm:$0xff]  ;;  %v141_v40 = vld [vmem:[#allocation7 + $0x70] sm:$0xff]  ;;  %vm147_vm2 = vcmp.eq.s32.totalorder %v146_v17, 17 }
  0x4f   :  { %634 = vmatprep.subr.bf16.mxu1 %v825_v0  ;;  %328 = vperm.xlu0 %685, %v940_v8   ;;  %v332_v13 = vsub.f32 1.0, %v940_v8  ;;  %v665_v39 = vpack.c.bf16 %v140_v38, %v139_v37  ;;  %v142_v41 = vld [vmem:[#allocation7 + $0x78] sm:$0xff]  ;;  %v152_v44 = vld [vmem:[#allocation2] sm:$0xff]  ;;  %v153_v47 = vld [vmem:[#allocation2 + $0x8] sm:$0xff] }
  0x50   :  { %v668_v42 = vpack.c.bf16 %v142_v41, %v141_v40  ;;  %v483_v56 = vld [vmem:[%s1012_s4] ss:$0 sm:$0xff]  ;;  %v154_v60 = vld [vmem:[#allocation2 + $0x10] sm:$0xff] }
  0x51   :  { %613 = vmatpush1.bf16.msra.mxu0 %v612_v52  ;;  %v484_v19 = vld [vmem:[%s1014_s6] ss:$0 sm:$0xff] }
  0x52   :  { %615 = vmatprep.subr.bf16.mxu0 %v614_v55  ;;  %636 = vmatpush3.bf16.msra.mxu1 %v635_v63 }
  0x53   :  { %637 = vmatprep.subr.bf16.mxu1 %v825_v0  ;;  %335 = vperm.xlu0 %685, %v332_v13  }
  0x55   :  { %617 = vmatpush1.bf16.msra.mxu0 %v616_v61 }
  0x56   :  { %619 = vmatprep.subr.bf16.mxu0 %v618_v3  ;;  %639 = vmatpush3.bf16.msra.mxu1 %v638_v10 }
  0x57   :  { %640 = vmatprep.subr.bf16.mxu1 %v825_v0 }
  0x59   :  { %621 = vmatpush1.bf16.msra.mxu0 %v620_v9 }
  0x5a   :  { %646 = vmatprep.subr.bf16.mxu0 %v825_v0  ;;  %642 = vmatpush3.bf16.msra.mxu1 %v641_v15 }
  0x5b   :  { %643 = vmatprep.subr.bf16.mxu1 %v825_v0 }
  0x5c   :  { %222 = vmatmul.mubr.f32.vlgmr.msra.gmra.mrb[0].mxu0 %v948_v14 }
  0x5d   :  { %587 = vmatprep.mubr.msk.f32.mxu0 %vm827_vm0, %v826_v1  ;;  %648 = vmatpush3.bf16.msra.mxu0 %v647_v21 }
  0x5e   :  { %645 = vmatpush3.bf16.msra.mxu1 %v644_v18  ;;  %649 = vmatprep.subr.bf16.mxu0 %v825_v0  ;;  %v480_v18 = vsel %vm147_vm2, 1.0, %v826_v1 }
  0x61   :  { %553 = vmatmul.mubr.f32.vlgmr.msra.gmra.mrb[0].mxu1 %v948_v14  ;;  %651 = vmatpush3.bf16.msra.mxu0 %v650_v24 }
  0x62   :  { %652 = vmatprep.subr.bf16.mxu0 %v825_v0 }
  0x65   :  { %654 = vmatpush3.bf16.msra.mxu0 %v653_v27 }
  0x66   :  { %655 = vmatprep.subr.bf16.mxu0 %v825_v0 }
  0x69   :  { %657 = vmatpush3.bf16.msra.mxu0 %v656_v30 }
  0x6a   :  { %658 = vmatprep.subr.bf16.mxu0 %v825_v0 }
  0x6d   :  { %660 = vmatpush3.bf16.msra.mxu0 %v659_v33 }
  0x6e   :  { %661 = vmatprep.subr.bf16.mxu0 %v825_v0 }
  0x71   :  { %663 = vmatpush3.bf16.msra.mxu0 %v662_v36 }
  0x72   :  { %664 = vmatprep.subr.bf16.mxu0 %v825_v0 }
  0x75   :  { %666 = vmatpush3.bf16.msra.mxu0 %v665_v39 }
  0x76   :  { %667 = vmatprep.subr.bf16.mxu0 %v825_v0 }
  0x79   :  { %669 = vmatpush3.bf16.msra.mxu0 %v668_v42 }
  0xce   :  { %v329_v3 = vpop.permute.xlu0 %328 }
  0xcf   :  { %v440_v21 = vmul.f32 %v480_v18, %v329_v3 }
  0xd2   :  { %v336_v9 = vpop.permute.xlu0 %335 }
  0xd3   :  { %v338_v12 = vmul.f32 %v336_v9, %v948_v14 }
 0x12f   :  { %v223_v45 = vpop.f32.mrb[0].mxu0 }
 0x130   :  { %v298_v46 = vadd.f32 %v223_v45, %v152_v44  ;;  %v225_v48 = vpop.f32.mrb[1].mxu0 }
 0x131   :  { %v305_v50 = vadd.f32 %v225_v48, %v153_v47 }
 0x132   :  { %v481_v49 = vmul.f32 -1.442695, %v298_v46 }
 0x133   :  { %v482_v51 = vmul.f32 -1.442695, %v305_v50 }
 0x134   :  { %686 = vpow2.f32 %v481_v49  ;;  %v294_v52 = vpop.f32.mrb[0].mxu1 }
 0x135   :  { %v554_v53 = vpop.f32.mrb[1].mxu1  ;;  %688 = vpow2.f32 %v482_v51  ;;  %v318_v58 = vadd.f32 %v483_v56, %v294_v52 }
 0x13e   :  { %v687_v0 = vpop.eup %686 }
 0x13f   :  { %v302_v54 = vadd.f32 1.0, %v687_v0  ;;  %v689_v55 = vpop.eup %688 }
 0x140   :  { %v309_v57 = vadd.f32 1.0, %v689_v55 }
 0x141   :  { %690 = vrcp.f32 %v302_v54 }
 0x142   :  { %692 = vrcp.f32 %v309_v57 }
 0x14b   :  { %v691_v59 = vpop.eup %690 }
 0x14c   :  { %v319_v61 = vmul.f32 %v691_v59, %v318_v58  ;;  %v693_v63 = vpop.eup %692 }
 0x14d   :  { %v322_v4 = vsub.f32 1.0, %v693_v63  ;;  %v324_v7 = vmul.f32 %v693_v63, %v948_v14 }
 0x14e   :  { %v320_v62 = vadd.f32 %v319_v61, %v154_v60 }
 0x150   :  { %694 = vtanh.f32 %v320_v62 }
 0x15a   :  { %v695_v5 = vpop.eup %694 }
 0x15b   :  { %v323_v6 = vmul.f32 %v695_v5, %v322_v4 }
 0x15d   :  { %v325_v10 = vadd.f32 %v324_v7, %v323_v6 }
 0x15f   :  { %v331_v11 = vmul.f32 %v329_v3, %v325_v10 }
 0x161   :  { %v339_v15 = vadd.f32 %v338_v12, %v331_v11 }
 0x163   :  { %443 = vst [vmem:[#allocation9] sm:$0xff] %v339_v15  ;;  %588 = vmatmul.mubr.f32.vlgmr.msra.gmra.mrb[2].mxu0 %v339_v15 }
 0x236   :  { %v412_v20 = vpop.f32.mrb[2].mxu0 }
 0x237   :  { %v413_v22 = vadd.f32 %v484_v19, %v412_v20  ;;  %v589_v23 = vpop.f32.mrb[3].mxu0 }
 0x239   :  { %v485_v24 = vmul.f32 -1.442695, %v413_v22  ;;  %v441_v25 = vadd.f32 %v440_v21, %v413_v22 }
 0x23b   :  { %696 = vpow2.f32 %v485_v24  ;;  %442 = vst [vmem:[#allocation8] sm:$0xff] %v441_v25 }
 0x245   :  { %v697_v14 = vpop.eup %696 }
 0x246   :  { %v419_v26 = vadd.f32 1.0, %v697_v14 }
 0x248   :  { %698 = vrcp.f32 %v419_v26 }
 0x249   :  { %777 = shalt.err (!%p774_p0)
}
 0x24a   :  { %s778_s19 = scalar_lea.hbm %s1015_s7, 128 }
 0x24b   :  { %p779_p1 = scmp.ne.s32.totalorder %s1015_s7, %s778_s19  ;;  %p782_p2 = scmp.lt.u32.totalorder %s778_s19, %s1015_s7 }
 0x24d   :  { %p784_p3 = pnand %p782_p2, %p779_p1 }
 0x24f   :  { %787 = shalt.err (!%p784_p3)
}
 0x250   :  { %455 = dma.vmem_to_hbm [thread:$0]  %s453_s14, 128, %s1015_s7, [#allocation4]  }
 0x251   :  { %s788_s25 = scalar_lea.vmem %s463_s16, 128  ;;  %p793_p5 = scmp.lt.s32.totalorder %s463_s16, %s463_s16 }
 0x252   :  { %p789_p4 = scmp.ne.s32.totalorder %s463_s16, %s788_s25  ;;  %p794_p6 = scmp.lt.s32.totalorder %s788_s25, %s788_s25 }
 0x254   :  { %p795_p7 = por %p794_p6, %p793_p5 }
 0x256   :  { %p796_p8 = pnand %p795_p7, %p789_p4 }
 0x258   :  { %799 = shalt.err (!%p796_p8)
}
 0x259   :  { %s800_s27 = scalar_lea.hbm %s1016_s8, 128 }
 0x25a   :  { %p801_p9 = scmp.ne.s32.totalorder %s1016_s8, %s800_s27  ;;  %p804_p10 = scmp.lt.u32.totalorder %s800_s27, %s1016_s8 }
 0x25c   :  { %p806_p11 = pnand %p804_p10, %p801_p9 }
 0x25e   :  { %809 = shalt.err (!%p806_p11)
}
 0x25f   :  { %465 = dma.vmem_to_hbm [thread:$0]  %s463_s16, 128, %s1016_s8, [#allocation10]   ;;  %v430_v1 = vpop.permute.xlu1 %429  ;;  %v699_v27 = vpop.eup %698 }
 0x260   :  { %v432_v28 = vmin.f32 %v699_v27, %v430_v1  ;;  %s832_s1 = smov 112  }
 0x261   :  { %423 = vrot.lane.b32.xlu0 %v699_v27, %s832_s1 }
 0x262   :  { %434 = vrot.lane.b32.xlu1 %v432_v28, %s832_s1 }
 0x2d3   :  { %v424_v29 = vpop.permute.xlu0 %423 }
 0x2d4   :  { %v435_v30 = vpop.permute.xlu1 %434  ;;  %v426_v32 = vmul.f32 %v424_v29, %v940_v8 }
 0x2d5   :  { %v437_v31 = vadd.f32 %v435_v30, %v936_v2 }
 0x2d7   :  { %v438_v33 = vmul.f32 %v437_v31, %v332_v13 }
 0x2d9   :  { %v439_v34 = vadd.f32 %v438_v33, %v426_v32 }
 0x2db   :  { %445 = vst.msk [vmem:[%s1017_s9] sm:$0xff] %vm77_vm1, %v439_v34 }
 0x2dc   :  { %814 = dma.done.wait [#allocation4], 128  }
 0x2dd   :  { %815 = vsyncadd [#allocation4], 4294967168 }
 0x2de   :  { %816 = dma.done.wait [#allocation10], 128  }
 0x2df   :  { %817 = vsyncadd [#allocation10], 4294967168 }
 0x2e0   :  { %476 = vsyncpa [#allocation3], 1 }
 0x2e1   :  { %477 = vsyncpa [#allocation6], 1 }
 0x2e2   :  { %478 = vsyncpa [#allocation4], 1 }
 0x2e3   :  { %479 = vsyncpa [#allocation10], 1 }

</bundles_post_ra>
